<compile_context>
chip_gen: v5e
topology: v5e:2x2
jax: 0.10.0
libtpu: 0.0.40
codegen_flags: <defaults>
</compile_context>

<pallas_src>
import functools

import numpy as np
import jax
import jax.numpy as jnp
from jax.experimental import pallas as pl
from jax.experimental.pallas import tpu as pltpu


def make_positional_encoding(d_model: int, max_len: int = 5000) -> jnp.ndarray:
    """(max_len, d_model) float32 table, exactly as the PyTorch __init__ builds it.
    (The module stores it as (max_len, 1, d_model); the singleton axis only exists
    for broadcasting, which the kernel handles itself.)"""
    position = np.arange(0, max_len, dtype=np.float32)[:, None]       # (max_len, 1)
    div_term = 1.0 / 10000 ** (2 * np.arange(d_model) / d_model)      # (d_model,)
    pe = np.zeros((max_len, d_model), dtype=np.float32)
    pe[:, 0::2] = np.sin(position * div_term[0::2])
    pe[:, 1::2] = np.cos(position * div_term[1::2])
    return jnp.asarray(pe)


def _add_pe_kernel(x_ref, pe_ref, o_ref, *, batch: int, d_model: int):
    # x_ref / o_ref : (tS, B*D) slab tile in VMEM;  pe_ref : (tS, D) float32 tile.
    pe = pe_ref[...].astype(jnp.float32)
    # B static slice-adds instead of a lane-axis concatenate: no (tS, B*D)
    # broadcast temporary, no per-replica XLU lane rotates.
    for b in range(batch):
        sl = slice(b * d_model, (b + 1) * d_model)
        o_ref[:, sl] = (x_ref[:, sl].astype(jnp.float32) + pe).astype(o_ref.dtype)


def _pick_seq_tile(S: int, row_bytes: int, sublane: int,
                   target_bytes: int, min_split_bytes: int = 1 << 20) -> int:
    """Sequence-tile size: ~target_bytes per x tile, rounded to the sublane packing
    multiple. For short sequences, prefer >=2 grid steps (v7x: two TensorCores
    shard the 'parallel' axis) as long as tiles stay >= ~1 MiB."""
    ts = max(1, target_bytes // max(1, row_bytes))
    if ts >= S:
        half = ((S // 2) // sublane) * sublane
        if half >= sublane and half * row_bytes >= min_split_bytes:
            return half
        return S
    return max(sublane, (ts // sublane) * sublane)


def positional_encoding_forward(x: jnp.ndarray, pe: jnp.ndarray,
                                *, target_bytes: int = 4 << 20) -> jnp.ndarray:
    """x: (seq_len, batch, d_model); pe: (max_len, d_model) float32 table.
    Returns x + pe[:seq_len] broadcast over the batch axis, in x.dtype."""
    S, B, D = x.shape
    dtype = x.dtype
    itemsize = jnp.dtype(dtype).itemsize
    sublane = max(8, 32 // itemsize)           # 8 for f32, 16 for bf16, 32 for int8
    ts = _pick_seq_tile(S, B * D * itemsize, sublane, target_bytes)

    # The pe tile's second-to-last dim must be a sublane multiple or span the full
    # pe array. Only for a tiny, unaligned S do we fall back to a (cheap) slice.
    pe_in = pe
    if ts == S and (S % sublane != 0) and (S != pe.shape[0]):
        pe_in = pe[:S]

    x2 = x.reshape(S, B * D)                   # row-major merge: free

    out2 = pl.pallas_call(
        functools.partial(_add_pe_kernel, batch=B, d_model=D),
        out_shape=jax.ShapeDtypeStruct((S, B * D), dtype),
        grid_spec=pltpu.PrefetchScalarGridSpec(
            num_scalar_prefetch=0,
            grid=(pl.cdiv(S, ts),),
            in_specs=[
                pl.BlockSpec((ts, B * D), lambda i: (i, 0)),   # x slab tile
                pl.BlockSpec((ts, D), lambda i: (i, 0)),       # pe rows [i*ts, i*ts+ts)
            ],
            out_specs=pl.BlockSpec((ts, B * D), lambda i: (i, 0)),
        ),
        input_output_aliases={0: 0},            # output reuses x's HBM buffer
        compiler_params=pltpu.CompilerParams(
            dimension_semantics=("parallel",),   # lets v7x shard across both TCs
            vmem_limit_bytes=32 << 20,           # 4 MiB tiles fit on v5e/v6e/v7x
        ),
    )(x2, pe_in)

    return out2.reshape(S, B, D)


if __name__ == "__main__":
    d_model, max_len = 32, 64   # small buffer for the demo (module default is 5000)
    pe = make_positional_encoding(d_model, max_len=max_len)

    def ref_forward(xx):
        # Plain-JAX semantics of the PyTorch forward (fp32 pe, broadcast over batch).
        s = xx.shape[0]
        return (xx.astype(jnp.float32)
                + jnp.broadcast_to(pe[:s][:, None, :], xx.shape)).astype(xx.dtype)

    key = jax.random.PRNGKey(0)
    k0, k1 = jax.random.split(key)

    # Primary case: seq=8, batch=2, d_model=32.
    x = jax.random.normal(k0, (8, 2, d_model), dtype=jnp.float32)
    out = jax.block_until_ready(positional_encoding_forward(x, pe))
    np.testing.assert_allclose(np.asarray(out), np.asarray(ref_forward(x)),
                               rtol=1e-6, atol=1e-6)

    # Secondary case: force a tiny tile target to exercise a multi-step grid with a
    # non-divisible sequence (masked last-block writeback path).
    x_odd = jax.random.normal(k1, (20, 2, d_model), dtype=jnp.float32)
    out_odd = jax.block_until_ready(
        positional_encoding_forward(x_odd, pe, target_bytes=2048))
    np.testing.assert_allclose(np.asarray(out_odd), np.asarray(ref_forward(x_odd)),
                               rtol=1e-6, atol=1e-6)

    print("KERNEL_OK")
</pallas_src>

<mosaic_0001>
module attributes {stable_mosaic.version = 11 : i64} {
  func.func @_add_pe_kernel(%arg0: i32, %arg1: memref<8x64xf32, #tpu.memory_space<vmem>>, %arg2: memref<8x32xf32, #tpu.memory_space<vmem>>, %arg3: memref<8x64xf32, #tpu.memory_space<vmem>>) attributes {dimension_semantics = [#tpu.dimension_semantics<parallel>], iteration_bounds = array<i64: 1>, scalar_prefetch = 0 : i64, scratch_operands = 0 : i64, tpu.core_type = #tpu.core_type<tc>, window_params = [{transform_indices = @transform_0, window_bounds = array<i64: 8, 64>}, {transform_indices = @transform_1, window_bounds = array<i64: 8, 32>}, {transform_indices = @transform_2, window_bounds = array<i64: 8, 64>}]} {
    %c0 = arith.constant 0 : index
    %c0_0 = arith.constant 0 : index
    %0 = vector.load %arg2[%c0, %c0_0] : memref<8x32xf32, #tpu.memory_space<vmem>>, vector<8x32xf32>
    %c0_1 = arith.constant 0 : index
    %c0_2 = arith.constant 0 : index
    %1 = vector.load %arg1[%c0_1, %c0_2] : memref<8x64xf32, #tpu.memory_space<vmem>>, vector<8x32xf32>
    %2 = arith.addf %1, %0 : vector<8x32xf32>
    %c0_3 = arith.constant 0 : index
    %c0_4 = arith.constant 0 : index
    %3 = vector.load %arg3[%c0_3, %c0_4] : memref<8x64xf32, #tpu.memory_space<vmem>>, vector<8x32xf32>
    tpu.vector_store %arg3[%c0_3, %c0_4], %2 {strides = array<i32>} : memref<8x64xf32, #tpu.memory_space<vmem>>, vector<8x32xf32>,
    %c0_5 = arith.constant 0 : index
    %c32 = arith.constant 32 : index
    %4 = vector.load %arg1[%c0_5, %c32] : memref<8x64xf32, #tpu.memory_space<vmem>>, vector<8x32xf32>
    %5 = arith.addf %4, %0 : vector<8x32xf32>
    %c0_6 = arith.constant 0 : index
    %c32_7 = arith.constant 32 : index
    %6 = vector.load %arg3[%c0_6, %c32_7] : memref<8x64xf32, #tpu.memory_space<vmem>>, vector<8x32xf32>
    tpu.vector_store %arg3[%c0_6, %c32_7], %5 {strides = array<i32>} : memref<8x64xf32, #tpu.memory_space<vmem>>, vector<8x32xf32>,
    return
  }
  func.func @transform_0(%arg0: i32) -> (i32, i32) {
    %c0_i32 = arith.constant 0 : i32
    %c0_i32_0 = arith.constant 0 : i32
    return %arg0, %c0_i32 : i32, i32
  }
  func.func @transform_1(%arg0: i32) -> (i32, i32) {
    %c0_i32 = arith.constant 0 : i32
    %c0_i32_0 = arith.constant 0 : i32
    return %arg0, %c0_i32 : i32, i32
  }
  func.func @transform_2(%arg0: i32) -> (i32, i32) {
    %c0_i32 = arith.constant 0 : i32
    %c0_i32_0 = arith.constant 0 : i32
    return %arg0, %c0_i32 : i32, i32
  }
}

</mosaic_0001>

<bundles_post_ra>
// kernel: tpu_custom_call.1
= control target key start
LH: loop header
LB: loop body
LE: loop exit
PB: predicated region body
PF: predicated region fallthrough
CT: control target
= control target key end

     0   :  { %7 = vsyncpa [#allocation3], 0  ;;  %s138_s0 = inlined_call_operand.hbm [shape: f32[8,64], index: 0, kind: input, shape index: {}, may-alias: {0,2}]   ;;  %s139_s1 = inlined_call_operand.vmem [shape: f32[64,32], index: 1, kind: input, shape index: {}]   ;;  %s140_s2 = inlined_call_operand.hbm [shape: f32[8,64], index: 2, kind: output, shape index: {}, may-alias: {0,2}]  }
   0x1   :  { %8 = vsyncpa [#allocation4], 0  ;;  %s14_s11 = sshll.u32 %s138_s0, 4  ;;  %s111_s12 = smov [#allocation2]   ;;  %s15_s11 = int_to_ptr.hbm [resolvable:$true] %s14_s11 }
   0x2   :  { %s16_s13 = sshll.u32 %s111_s12, 4  ;;  %s17_s13 = int_to_ptr.vmem [resolvable:$true] %s16_s13 }
   0x3   :  { %19 = dma.hbm_to_vmem [thread:$0]  %s15_s11, 128, %s17_s13, [#allocation3]  }
   0x4   :  { %107 = dma.done.wait [#allocation3], 128  }
   0x5   :  { %108 = vsyncadd [#allocation3], 4294967168  ;;  %v26_v0 = vld [vmem:[%s139_s1] sm:$0xff]  ;;  %vm29_vm0 = vcmask 261120   ;;  %s112_s16 = smov 32   ;;  %s113_s17 = smov [#allocation5]  }
   0x6   :  { %v27_v1 = vld [vmem:[#allocation2] sm:$0xff]  ;;  %33 = vrot.lane.b32.xlu0 %v26_v0, %s112_s16  ;;  %s44_s18 = sshll.u32 %s113_s17, 4  ;;  %s46_s20 = sshll.u32 %s140_s2, 4  ;;  %vm37_vm1 = vcmask 523520   ;;  %s45_s18 = int_to_ptr.vmem [resolvable:$true] %s44_s18  ;;  %s47_s20 = int_to_ptr.hbm [resolvable:$true] %s46_s20 }
   0x7   :  { %v28_v2 = vadd.f32 %v27_v1, %v26_v0 }
   0x9   :  { %30 = vst.msk [vmem:[#allocation5] sm:$0xff] %vm29_vm0, %v28_v2 }
  0x78   :  { %v34_v3 = vpop.permute.xlu0 %33 }
  0x79   :  { %v36_v4 = vadd.f32 %v34_v3, %v27_v1 }
  0x7b   :  { %38 = vst.msk [vmem:[#allocation5] sm:$0xff] %vm37_vm1, %v36_v4 }
  0x7c   :  { %49 = dma.vmem_to_hbm [thread:$0]  %s45_s18, 128, %s47_s20, [#allocation4]  }
  0x7d   :  { %109 = dma.done.wait [#allocation4], 128  }
  0x7e   :  { %110 = vsyncadd [#allocation4], 4294967168 }
  0x7f   :  { %54 = vsyncpa [#allocation3], 1 }
  0x80   :  { %55 = vsyncpa [#allocation4], 1 }

</bundles_post_ra>
